<compile_context>
chip_gen: v7x
topology: tpu7x:2x2x1
jax: 0.10.0
libtpu: 0.0.40
codegen_flags: <defaults>
</compile_context>

<pallas_src>
import jax
import jax.numpy as jnp
from jax import lax
from jax.experimental import pallas as pl
from jax.experimental.pallas import tpu as pltpu


def _lstm_kernel(x_ref,       # (T_CHUNK*B, E) bf16, rows ordered t-major, b-minor
                 wih0_ref,    # (E, 4H)  bf16
                 whh0_ref,    # (H, 4H)  bf16
                 b0_ref,      # (1, 4H)  f32   (b_ih_l0 + b_hh_l0)
                 w1_ref,      # (2H, 4H) bf16  ([Wih1; Whh1] stacked)
                 b1_ref,      # (1, 4H)  f32   (b_ih_l1 + b_hh_l1)
                 fcw_ref,     # (H, V)   bf16
                 fcb_ref,     # (1, V)   f32
                 out_ref,     # (B, V)   f32
                 h0s, h1s, c0s, c1s):  # VMEM scratch, each (B, H) f32
    B, H = h0s.shape
    TC = x_ref.shape[0] // B          # timesteps in this chunk (compile-time const)

    @pl.when(pl.program_id(0) == 0)
    def _init():
        h0s[...] = jnp.zeros_like(h0s)
        h1s[...] = jnp.zeros_like(h1s)
        c0s[...] = jnp.zeros_like(c0s)
        c1s[...] = jnp.zeros_like(c1s)

    # Hoisted layer-0 input projection for the whole chunk: one large MXU matmul,
    # with b0 folded in (broadcast once per chunk, not per timestep).
    xg = (jnp.dot(x_ref[...], wih0_ref[...], preferred_element_type=jnp.float32)
          + b0_ref[...])                                   # (TC*B, 4H) f32

    # Hoisted loop invariants.
    lane = lax.broadcasted_iota(jnp.int32, (B, 4 * H), 1)
    g_mask = (lane >= 2 * H) & (lane < 3 * H)              # tanh lanes ("g" gate)
    b1b = jnp.broadcast_to(b1_ref[...], (B, 4 * H))        # broadcast once per chunk
    whh0 = whh0_ref[...]
    w1 = w1_ref[...]

    def gate_act(z):
        # 1 full-width sigmoid + 1 full-width tanh on the packed (B, 4H) vreg,
        # lane-select the tanh gate -> 2 EUP passes per cell instead of 4.
        a = jnp.where(g_mask, jnp.tanh(z), jax.nn.sigmoid(z))
        return a[:, 0:H], a[:, H:2 * H], a[:, 2 * H:3 * H], a[:, 3 * H:4 * H]

    # Carry state in vregs across the (fully unrolled) chunk; scratch refs are
    # touched only at chunk boundaries.
    h0 = h0s[...]
    h1 = h1s[...]
    c0 = c0s[...]
    c1 = c1s[...]

    for t in range(TC):   # fully unrolled; grid axis bounds live ranges per chunk
        # ---- layer 0: input projection precomputed, only h @ Whh0 on the
        #      serial path (single MXU push per cell).
        g0 = xg[t * B:(t + 1) * B, :] + jnp.dot(
            h0.astype(jnp.bfloat16), whh0, preferred_element_type=jnp.float32)
        i0, f0, gg0, o0 = gate_act(g0)
        c0 = f0 * c0 + i0 * gg0
        h0 = o0 * jnp.tanh(c0)

        # ---- layer 1: fused [x=h0, h=h1] @ [Wih1; Whh1] (single MXU push).
        lhs1 = jnp.concatenate([h0, h1], axis=1).astype(jnp.bfloat16)
        g1 = jnp.dot(lhs1, w1, preferred_element_type=jnp.float32) + b1b
        i1, f1, gg1, o1 = gate_act(g1)
        c1 = f1 * c1 + i1 * gg1
        h1 = o1 * jnp.tanh(c1)

    # Persist state for the next time chunk.
    h0s[...] = h0
    h1s[...] = h1
    c0s[...] = c0
    c1s[...] = c1

    # fc(lstm_out[-1]) == fc(h1 at the final timestep of the last chunk).
    @pl.when(pl.program_id(0) == pl.num_programs(0) - 1)
    def _finalize():
        out_ref[...] = (jnp.dot(h1.astype(jnp.bfloat16), fcw_ref[...],
                                preferred_element_type=jnp.float32)
                        + fcb_ref[...])


def simple_lstm_forward(seq_in, params, *, time_chunk=4):
    """seq_in: (B, T) int32 token ids. Returns (B, n_vocab) float32 logits."""
    emb = params["embedding"]                       # (V, E) f32
    B, T = seq_in.shape
    E = emb.shape[1]
    H = params["whh0"].shape[0]
    V = params["fcw"].shape[1]
    H4 = 4 * H

    if T % time_chunk != 0:
        time_chunk = T                              # fall back to a single chunk
    n_chunks = T // time_chunk

    # embedded = embeddings(seq_in.t()) -> (T, B, E); flatten time/batch so the
    # layer-0 input projection is one big matmul per chunk; bf16 for the MXU.
    x2d = (jnp.take(emb, seq_in.T, axis=0)
           .reshape(T * B, E)
           .astype(jnp.bfloat16))

    bf = lambda a: a.astype(jnp.bfloat16)
    wih0 = bf(params["wih0"])                                           # (E, 4H)
    whh0 = bf(params["whh0"])                                           # (H, 4H)
    w1 = bf(jnp.concatenate([params["wih1"], params["whh1"]], axis=0))  # (2H, 4H)
    fcw = bf(params["fcw"])                                             # (H, V)
    b0, b1, fcb = params["b0"], params["b1"], params["fcb"]             # f32

    def full_spec(shape):
        return pl.BlockSpec(shape, lambda t: (0,) * len(shape))

    out = pl.pallas_call(
        _lstm_kernel,
        out_shape=jax.ShapeDtypeStruct((B, V), jnp.float32),
        grid=(n_chunks,),
        in_specs=[
            pl.BlockSpec((time_chunk * B, E), lambda t: (t, 0)),  # x, time-chunked
            full_spec((E, H4)),        # wih0
            full_spec((H, H4)),        # whh0
            full_spec((1, H4)),        # b0
            full_spec((2 * H, H4)),    # [Wih1; Whh1]
            full_spec((1, H4)),        # b1
            full_spec((H, V)),         # fcw
            full_spec((1, V)),         # fcb
        ],
        out_specs=pl.BlockSpec((B, V), lambda t: (0, 0)),
        scratch_shapes=[pltpu.VMEM((B, H), jnp.float32)] * 4,
        compiler_params=pltpu.CompilerParams(
            dimension_semantics=("arbitrary",)),
    )(x2d, wih0, whh0, b0, w1, b1, fcw, fcb)
    return out


def init_params(key, n_vocab, hidden_dim, embedding_dim):
    """Deterministic synthetic parameters with PyTorch-like shapes (pre-transposed)."""
    ks = jax.random.split(key, 12)
    s = 1.0 / jnp.sqrt(hidden_dim)
    u = lambda k, shape: jax.random.uniform(k, shape, jnp.float32, -s, s)
    H4 = 4 * hidden_dim
    params = {
        # nn.Embedding(n_vocab, embedding_dim): N(0, 1)
        "embedding": jax.random.normal(ks[0], (n_vocab, embedding_dim), jnp.float32),
        # layer 0:  weight_ih_l0 (4H, E) -> stored (E, 4H); weight_hh_l0 (4H, H) -> (H, 4H)
        "wih0": u(ks[1], (embedding_dim, H4)),
        "whh0": u(ks[2], (hidden_dim, H4)),
        "b0": (u(ks[3], (1, H4)) + u(ks[4], (1, H4))),   # b_ih_l0 + b_hh_l0
        # layer 1:  weight_ih_l1 (4H, H) -> (H, 4H)
        "wih1": u(ks[5], (hidden_dim, H4)),
        "whh1": u(ks[6], (hidden_dim, H4)),
        "b1": (u(ks[7], (1, H4)) + u(ks[8], (1, H4))),   # b_ih_l1 + b_hh_l1
        # fc: nn.Linear(hidden_dim, n_vocab): weight (V, H) -> (H, V), bias (V,) -> (1, V)
        "fcw": u(ks[9], (hidden_dim, n_vocab)),
        "fcb": u(ks[10], (1, n_vocab)),
    }
    return params


if __name__ == "__main__":
    n_vocab, hidden_dim, embedding_dim = 128, 32, 32
    B, T = 8, 8

    key = jax.random.PRNGKey(0)
    k_param, k_seq = jax.random.split(key)
    params = init_params(k_param, n_vocab, hidden_dim, embedding_dim)
    seq_in = jax.random.randint(k_seq, (B, T), 0, n_vocab, dtype=jnp.int32)

    out = simple_lstm_forward(seq_in, params, time_chunk=4)  # grid=(2,) exercises carry
    jax.block_until_ready(out)
    assert out.shape == (B, n_vocab)
    print("KERNEL_OK")
</pallas_src>

<mosaic_0001>
module attributes {stable_mosaic.version = 11 : i64} {
  func.func @_lstm_kernel(%arg0: i32, %arg1: memref<32x32xbf16, #tpu.memory_space<vmem>>, %arg2: memref<32x128xbf16, #tpu.memory_space<vmem>>, %arg3: memref<32x128xbf16, #tpu.memory_space<vmem>>, %arg4: memref<1x128xf32, #tpu.memory_space<vmem>>, %arg5: memref<64x128xbf16, #tpu.memory_space<vmem>>, %arg6: memref<1x128xf32, #tpu.memory_space<vmem>>, %arg7: memref<32x128xbf16, #tpu.memory_space<vmem>>, %arg8: memref<1x128xf32, #tpu.memory_space<vmem>>, %arg9: memref<8x128xf32, #tpu.memory_space<vmem>>, %arg10: memref<8x32xf32, #tpu.memory_space<vmem>>, %arg11: memref<8x32xf32, #tpu.memory_space<vmem>>, %arg12: memref<8x32xf32, #tpu.memory_space<vmem>>, %arg13: memref<8x32xf32, #tpu.memory_space<vmem>>) attributes {dimension_semantics = [#tpu.dimension_semantics<arbitrary>], iteration_bounds = array<i64: 2>, scalar_prefetch = 0 : i64, scratch_operands = 4 : i64, tpu.core_type = #tpu.core_type<tc>, window_params = [{transform_indices = @transform_0, window_bounds = array<i64: 32, 32>}, {pipeline_mode = #tpu.pipeline_mode<synchronous>, transform_indices = @transform_1, window_bounds = array<i64: 32, 128>}, {pipeline_mode = #tpu.pipeline_mode<synchronous>, transform_indices = @transform_2, window_bounds = array<i64: 32, 128>}, {pipeline_mode = #tpu.pipeline_mode<synchronous>, transform_indices = @transform_3, window_bounds = array<i64: 1, 128>}, {pipeline_mode = #tpu.pipeline_mode<synchronous>, transform_indices = @transform_4, window_bounds = array<i64: 64, 128>}, {pipeline_mode = #tpu.pipeline_mode<synchronous>, transform_indices = @transform_5, window_bounds = array<i64: 1, 128>}, {pipeline_mode = #tpu.pipeline_mode<synchronous>, transform_indices = @transform_6, window_bounds = array<i64: 32, 128>}, {pipeline_mode = #tpu.pipeline_mode<synchronous>, transform_indices = @transform_7, window_bounds = array<i64: 1, 128>}, {pipeline_mode = #tpu.pipeline_mode<synchronous>, transform_indices = @transform_8, window_bounds = array<i64: 8, 128>}]} {
    %c0_i32 = arith.constant 0 : i32
    %0 = arith.cmpi eq, %arg0, %c0_i32 : i32
    %1 = arith.extui %0 : i1 to i32
    %c0_i32_0 = arith.constant 0 : i32
    %2 = arith.cmpi ne, %1, %c0_i32_0 : i32
    scf.if %2 {
      %cst_45 = arith.constant 0.000000e+00 : f32
      %191 = vector.broadcast %cst_45 : f32 to vector<8x32xf32>
      %c0_46 = arith.constant 0 : index
      %c0_47 = arith.constant 0 : index
      %192 = vector.load %arg10[%c0_46, %c0_47] : memref<8x32xf32, #tpu.memory_space<vmem>>, vector<8x32xf32>
      tpu.vector_store %arg10[%c0_46, %c0_47], %191 {strides = array<i32>} : memref<8x32xf32, #tpu.memory_space<vmem>>, vector<8x32xf32>,
      %cst_48 = arith.constant 0.000000e+00 : f32
      %193 = vector.broadcast %cst_48 : f32 to vector<8x32xf32>
      %c0_49 = arith.constant 0 : index
      %c0_50 = arith.constant 0 : index
      %194 = vector.load %arg11[%c0_49, %c0_50] : memref<8x32xf32, #tpu.memory_space<vmem>>, vector<8x32xf32>
      tpu.vector_store %arg11[%c0_49, %c0_50], %193 {strides = array<i32>} : memref<8x32xf32, #tpu.memory_space<vmem>>, vector<8x32xf32>,
      %cst_51 = arith.constant 0.000000e+00 : f32
      %195 = vector.broadcast %cst_51 : f32 to vector<8x32xf32>
      %c0_52 = arith.constant 0 : index
      %c0_53 = arith.constant 0 : index
      %196 = vector.load %arg12[%c0_52, %c0_53] : memref<8x32xf32, #tpu.memory_space<vmem>>, vector<8x32xf32>
      tpu.vector_store %arg12[%c0_52, %c0_53], %195 {strides = array<i32>} : memref<8x32xf32, #tpu.memory_space<vmem>>, vector<8x32xf32>,
      %cst_54 = arith.constant 0.000000e+00 : f32
      %197 = vector.broadcast %cst_54 : f32 to vector<8x32xf32>
      %c0_55 = arith.constant 0 : index
      %c0_56 = arith.constant 0 : index
      %198 = vector.load %arg13[%c0_55, %c0_56] : memref<8x32xf32, #tpu.memory_space<vmem>>, vector<8x32xf32>
      tpu.vector_store %arg13[%c0_55, %c0_56], %197 {strides = array<i32>} : memref<8x32xf32, #tpu.memory_space<vmem>>, vector<8x32xf32>,
    } else {
    }
    %c0 = arith.constant 0 : index
    %c0_1 = arith.constant 0 : index
    %3 = vector.load %arg1[%c0, %c0_1] : memref<32x32xbf16, #tpu.memory_space<vmem>>, vector<32x32xbf16>
    %c0_2 = arith.constant 0 : index
    %c0_3 = arith.constant 0 : index
    %4 = vector.load %arg2[%c0_2, %c0_3] : memref<32x128xbf16, #tpu.memory_space<vmem>>, vector<32x128xbf16>
    %cst = arith.constant dense<0.000000e+00> : vector<32x128xf32>
    %5 = tpu.matmul %3, %4, %cst {dimension_numbers = #tpu.dot_dimension_numbers<[1], [0], [0], [1], [0, 0, 1, 1], [], []>} : vector<32x32xbf16>, vector<32x128xbf16>, vector<32x128xf32> -> vector<32x128xf32>
    %c0_4 = arith.constant 0 : index
    %c0_5 = arith.constant 0 : index
    %6 = vector.load %arg4[%c0_4, %c0_5] : memref<1x128xf32, #tpu.memory_space<vmem>>, vector<1x128xf32>
    %7 = vector.broadcast %6 : vector<1x128xf32> to vector<32x128xf32>
    %8 = arith.addf %5, %7 : vector<32x128xf32>
    %9 = tpu.iota {dimensions = array<i32: 1>} : vector<8x128xi32>
    %c64_i32 = arith.constant 64 : i32
    %10 = vector.broadcast %c64_i32 : i32 to vector<8x128xi32>
    %11 = arith.cmpi sge, %9, %10 : vector<8x128xi32>
    %c96_i32 = arith.constant 96 : i32
    %12 = vector.broadcast %c96_i32 : i32 to vector<8x128xi32>
    %13 = arith.cmpi slt, %9, %12 : vector<8x128xi32>
    %14 = arith.andi %11, %13 : vector<8x128xi1>
    %c0_6 = arith.constant 0 : index
    %c0_7 = arith.constant 0 : index
    %15 = vector.load %arg6[%c0_6, %c0_7] : memref<1x128xf32, #tpu.memory_space<vmem>>, vector<1x128xf32>
    %16 = vector.shape_cast %15 : vector<1x128xf32> to vector<1x128xf32>
    %17 = vector.broadcast %16 : vector<1x128xf32> to vector<8x128xf32>
    %c0_8 = arith.constant 0 : index
    %c0_9 = arith.constant 0 : index
    %18 = vector.load %arg3[%c0_8, %c0_9] : memref<32x128xbf16, #tpu.memory_space<vmem>>, vector<32x128xbf16>
    %c0_10 = arith.constant 0 : index
    %c0_11 = arith.constant 0 : index
    %19 = vector.load %arg5[%c0_10, %c0_11] : memref<64x128xbf16, #tpu.memory_space<vmem>>, vector<64x128xbf16>
    %c0_12 = arith.constant 0 : index
    %c0_13 = arith.constant 0 : index
    %20 = vector.load %arg10[%c0_12, %c0_13] : memref<8x32xf32, #tpu.memory_space<vmem>>, vector<8x32xf32>
    %c0_14 = arith.constant 0 : index
    %c0_15 = arith.constant 0 : index
    %21 = vector.load %arg11[%c0_14, %c0_15] : memref<8x32xf32, #tpu.memory_space<vmem>>, vector<8x32xf32>
    %c0_16 = arith.constant 0 : index
    %c0_17 = arith.constant 0 : index
    %22 = vector.load %arg12[%c0_16, %c0_17] : memref<8x32xf32, #tpu.memory_space<vmem>>, vector<8x32xf32>
    %c0_18 = arith.constant 0 : index
    %c0_19 = arith.constant 0 : index
    %23 = vector.load %arg13[%c0_18, %c0_19] : memref<8x32xf32, #tpu.memory_space<vmem>>, vector<8x32xf32>
    %24 = vector.extract_strided_slice %8 {offsets = [0, 0], sizes = [8, 128], strides = [1, 1]} : vector<32x128xf32> to vector<8x128xf32>
    %25 = arith.truncf %20 : vector<8x32xf32> to vector<8x32xbf16>
    %cst_20 = arith.constant dense<0.000000e+00> : vector<8x128xf32>
    %26 = tpu.matmul %25, %18, %cst_20 {dimension_numbers = #tpu.dot_dimension_numbers<[1], [0], [0], [1], [0, 0, 1, 1], [], []>} : vector<8x32xbf16>, vector<32x128xbf16>, vector<8x128xf32> -> vector<8x128xf32>
    %27 = arith.addf %24, %26 : vector<8x128xf32>
    %28 = math.tanh %27 : vector<8x128xf32>
    %29 = arith.negf %27 : vector<8x128xf32>
    %30 = math.exp %29 : vector<8x128xf32>
    %cst_21 = arith.constant 1.000000e+00 : f32
    %31 = vector.broadcast %cst_21 : f32 to vector<8x128xf32>
    %32 = arith.addf %31, %30 : vector<8x128xf32>
    %33 = arith.divf %31, %32 : vector<8x128xf32>
    %34 = arith.select %14, %28, %33 : vector<8x128xi1>, vector<8x128xf32>
    %35 = vector.extract_strided_slice %34 {offsets = [0, 0], sizes = [8, 32], strides = [1, 1]} : vector<8x128xf32> to vector<8x32xf32>
    %36 = vector.extract_strided_slice %34 {offsets = [0, 32], sizes = [8, 32], strides = [1, 1]} : vector<8x128xf32> to vector<8x32xf32>
    %37 = vector.extract_strided_slice %34 {offsets = [0, 64], sizes = [8, 32], strides = [1, 1]} : vector<8x128xf32> to vector<8x32xf32>
    %38 = vector.extract_strided_slice %34 {offsets = [0, 96], sizes = [8, 32], strides = [1, 1]} : vector<8x128xf32> to vector<8x32xf32>
    %39 = arith.mulf %36, %22 : vector<8x32xf32>
    %40 = arith.mulf %35, %37 : vector<8x32xf32>
    %41 = arith.addf %39, %40 : vector<8x32xf32>
    %42 = math.tanh %41 : vector<8x32xf32>
    %43 = arith.mulf %38, %42 : vector<8x32xf32>
    %44 = tpu.concatenate %43, %21 in 1 : vector<8x32xf32>, vector<8x32xf32> -> vector<8x64xf32>
    %45 = arith.truncf %44 : vector<8x64xf32> to vector<8x64xbf16>
    %cst_22 = arith.constant dense<0.000000e+00> : vector<8x128xf32>
    %46 = tpu.matmul %45, %19, %cst_22 {dimension_numbers = #tpu.dot_dimension_numbers<[1], [0], [0], [1], [0, 0, 1, 1], [], []>} : vector<8x64xbf16>, vector<64x128xbf16>, vector<8x128xf32> -> vector<8x128xf32>
    %47 = arith.addf %46, %17 : vector<8x128xf32>
    %48 = math.tanh %47 : vector<8x128xf32>
    %49 = arith.negf %47 : vector<8x128xf32>
    %50 = math.exp %49 : vector<8x128xf32>
    %cst_23 = arith.constant 1.000000e+00 : f32
    %51 = vector.broadcast %cst_23 : f32 to vector<8x128xf32>
    %52 = arith.addf %51, %50 : vector<8x128xf32>
    %53 = arith.divf %51, %52 : vector<8x128xf32>
    %54 = arith.select %14, %48, %53 : vector<8x128xi1>, vector<8x128xf32>
    %55 = vector.extract_strided_slice %54 {offsets = [0, 0], sizes = [8, 32], strides = [1, 1]} : vector<8x128xf32> to vector<8x32xf32>
    %56 = vector.extract_strided_slice %54 {offsets = [0, 32], sizes = [8, 32], strides = [1, 1]} : vector<8x128xf32> to vector<8x32xf32>
    %57 = vector.extract_strided_slice %54 {offsets = [0, 64], sizes = [8, 32], strides = [1, 1]} : vector<8x128xf32> to vector<8x32xf32>
    %58 = vector.extract_strided_slice %54 {offsets = [0, 96], sizes = [8, 32], strides = [1, 1]} : vector<8x128xf32> to vector<8x32xf32>
    %59 = arith.mulf %56, %23 : vector<8x32xf32>
    %60 = arith.mulf %55, %57 : vector<8x32xf32>
    %61 = arith.addf %59, %60 : vector<8x32xf32>
    %62 = math.tanh %61 : vector<8x32xf32>
    %63 = arith.mulf %58, %62 : vector<8x32xf32>
    %64 = vector.extract_strided_slice %8 {offsets = [8, 0], sizes = [8, 128], strides = [1, 1]} : vector<32x128xf32> to vector<8x128xf32>
    %65 = arith.truncf %43 : vector<8x32xf32> to vector<8x32xbf16>
    %cst_24 = arith.constant dense<0.000000e+00> : vector<8x128xf32>
    %66 = tpu.matmul %65, %18, %cst_24 {dimension_numbers = #tpu.dot_dimension_numbers<[1], [0], [0], [1], [0, 0, 1, 1], [], []>} : vector<8x32xbf16>, vector<32x128xbf16>, vector<8x128xf32> -> vector<8x128xf32>
    %67 = arith.addf %64, %66 : vector<8x128xf32>
    %68 = math.tanh %67 : vector<8x128xf32>
    %69 = arith.negf %67 : vector<8x128xf32>
    %70 = math.exp %69 : vector<8x128xf32>
    %cst_25 = arith.constant 1.000000e+00 : f32
    %71 = vector.broadcast %cst_25 : f32 to vector<8x128xf32>
    %72 = arith.addf %71, %70 : vector<8x128xf32>
    %73 = arith.divf %71, %72 : vector<8x128xf32>
    %74 = arith.select %14, %68, %73 : vector<8x128xi1>, vector<8x128xf32>
    %75 = vector.extract_strided_slice %74 {offsets = [0, 0], sizes = [8, 32], strides = [1, 1]} : vector<8x128xf32> to vector<8x32xf32>
    %76 = vector.extract_strided_slice %74 {offsets = [0, 32], sizes = [8, 32], strides = [1, 1]} : vector<8x128xf32> to vector<8x32xf32>
    %77 = vector.extract_strided_slice %74 {offsets = [0, 64], sizes = [8, 32], strides = [1, 1]} : vector<8x128xf32> to vector<8x32xf32>
    %78 = vector.extract_strided_slice %74 {offsets = [0, 96], sizes = [8, 32], strides = [1, 1]} : vector<8x128xf32> to vector<8x32xf32>
    %79 = arith.mulf %76, %41 : vector<8x32xf32>
    %80 = arith.mulf %75, %77 : vector<8x32xf32>
    %81 = arith.addf %79, %80 : vector<8x32xf32>
    %82 = math.tanh %81 : vector<8x32xf32>
    %83 = arith.mulf %78, %82 : vector<8x32xf32>
    %84 = tpu.concatenate %83, %63 in 1 : vector<8x32xf32>, vector<8x32xf32> -> vector<8x64xf32>
    %85 = arith.truncf %84 : vector<8x64xf32> to vector<8x64xbf16>
    %cst_26 = arith.constant dense<0.000000e+00> : vector<8x128xf32>
    %86 = tpu.matmul %85, %19, %cst_26 {dimension_numbers = #tpu.dot_dimension_numbers<[1], [0], [0], [1], [0, 0, 1, 1], [], []>} : vector<8x64xbf16>, vector<64x128xbf16>, vector<8x128xf32> -> vector<8x128xf32>
    %87 = arith.addf %86, %17 : vector<8x128xf32>
    %88 = math.tanh %87 : vector<8x128xf32>
    %89 = arith.negf %87 : vector<8x128xf32>
    %90 = math.exp %89 : vector<8x128xf32>
    %cst_27 = arith.constant 1.000000e+00 : f32
    %91 = vector.broadcast %cst_27 : f32 to vector<8x128xf32>
    %92 = arith.addf %91, %90 : vector<8x128xf32>
    %93 = arith.divf %91, %92 : vector<8x128xf32>
    %94 = arith.select %14, %88, %93 : vector<8x128xi1>, vector<8x128xf32>
    %95 = vector.extract_strided_slice %94 {offsets = [0, 0], sizes = [8, 32], strides = [1, 1]} : vector<8x128xf32> to vector<8x32xf32>
    %96 = vector.extract_strided_slice %94 {offsets = [0, 32], sizes = [8, 32], strides = [1, 1]} : vector<8x128xf32> to vector<8x32xf32>
    %97 = vector.extract_strided_slice %94 {offsets = [0, 64], sizes = [8, 32], strides = [1, 1]} : vector<8x128xf32> to vector<8x32xf32>
    %98 = vector.extract_strided_slice %94 {offsets = [0, 96], sizes = [8, 32], strides = [1, 1]} : vector<8x128xf32> to vector<8x32xf32>
    %99 = arith.mulf %96, %61 : vector<8x32xf32>
    %100 = arith.mulf %95, %97 : vector<8x32xf32>
    %101 = arith.addf %99, %100 : vector<8x32xf32>
    %102 = math.tanh %101 : vector<8x32xf32>
    %103 = arith.mulf %98, %102 : vector<8x32xf32>
    %104 = vector.extract_strided_slice %8 {offsets = [16, 0], sizes = [8, 128], strides = [1, 1]} : vector<32x128xf32> to vector<8x128xf32>
    %105 = arith.truncf %83 : vector<8x32xf32> to vector<8x32xbf16>
    %cst_28 = arith.constant dense<0.000000e+00> : vector<8x128xf32>
    %106 = tpu.matmul %105, %18, %cst_28 {dimension_numbers = #tpu.dot_dimension_numbers<[1], [0], [0], [1], [0, 0, 1, 1], [], []>} : vector<8x32xbf16>, vector<32x128xbf16>, vector<8x128xf32> -> vector<8x128xf32>
    %107 = arith.addf %104, %106 : vector<8x128xf32>
    %108 = math.tanh %107 : vector<8x128xf32>
    %109 = arith.negf %107 : vector<8x128xf32>
    %110 = math.exp %109 : vector<8x128xf32>
    %cst_29 = arith.constant 1.000000e+00 : f32
    %111 = vector.broadcast %cst_29 : f32 to vector<8x128xf32>
    %112 = arith.addf %111, %110 : vector<8x128xf32>
    %113 = arith.divf %111, %112 : vector<8x128xf32>
    %114 = arith.select %14, %108, %113 : vector<8x128xi1>, vector<8x128xf32>
    %115 = vector.extract_strided_slice %114 {offsets = [0, 0], sizes = [8, 32], strides = [1, 1]} : vector<8x128xf32> to vector<8x32xf32>
    %116 = vector.extract_strided_slice %114 {offsets = [0, 32], sizes = [8, 32], strides = [1, 1]} : vector<8x128xf32> to vector<8x32xf32>
    %117 = vector.extract_strided_slice %114 {offsets = [0, 64], sizes = [8, 32], strides = [1, 1]} : vector<8x128xf32> to vector<8x32xf32>
    %118 = vector.extract_strided_slice %114 {offsets = [0, 96], sizes = [8, 32], strides = [1, 1]} : vector<8x128xf32> to vector<8x32xf32>
    %119 = arith.mulf %116, %81 : vector<8x32xf32>
    %120 = arith.mulf %115, %117 : vector<8x32xf32>
    %121 = arith.addf %119, %120 : vector<8x32xf32>
    %122 = math.tanh %121 : vector<8x32xf32>
    %123 = arith.mulf %118, %122 : vector<8x32xf32>
    %124 = tpu.concatenate %123, %103 in 1 : vector<8x32xf32>, vector<8x32xf32> -> vector<8x64xf32>
    %125 = arith.truncf %124 : vector<8x64xf32> to vector<8x64xbf16>
    %cst_30 = arith.constant dense<0.000000e+00> : vector<8x128xf32>
    %126 = tpu.matmul %125, %19, %cst_30 {dimension_numbers = #tpu.dot_dimension_numbers<[1], [0], [0], [1], [0, 0, 1, 1], [], []>} : vector<8x64xbf16>, vector<64x128xbf16>, vector<8x128xf32> -> vector<8x128xf32>
    %127 = arith.addf %126, %17 : vector<8x128xf32>
    %128 = math.tanh %127 : vector<8x128xf32>
    %129 = arith.negf %127 : vector<8x128xf32>
    %130 = math.exp %129 : vector<8x128xf32>
    %cst_31 = arith.constant 1.000000e+00 : f32
    %131 = vector.broadcast %cst_31 : f32 to vector<8x128xf32>
    %132 = arith.addf %131, %130 : vector<8x128xf32>
    %133 = arith.divf %131, %132 : vector<8x128xf32>
    %134 = arith.select %14, %128, %133 : vector<8x128xi1>, vector<8x128xf32>
    %135 = vector.extract_strided_slice %134 {offsets = [0, 0], sizes = [8, 32], strides = [1, 1]} : vector<8x128xf32> to vector<8x32xf32>
    %136 = vector.extract_strided_slice %134 {offsets = [0, 32], sizes = [8, 32], strides = [1, 1]} : vector<8x128xf32> to vector<8x32xf32>
    %137 = vector.extract_strided_slice %134 {offsets = [0, 64], sizes = [8, 32], strides = [1, 1]} : vector<8x128xf32> to vector<8x32xf32>
    %138 = vector.extract_strided_slice %134 {offsets = [0, 96], sizes = [8, 32], strides = [1, 1]} : vector<8x128xf32> to vector<8x32xf32>
    %139 = arith.mulf %136, %101 : vector<8x32xf32>
    %140 = arith.mulf %135, %137 : vector<8x32xf32>
    %141 = arith.addf %139, %140 : vector<8x32xf32>
    %142 = math.tanh %141 : vector<8x32xf32>
    %143 = arith.mulf %138, %142 : vector<8x32xf32>
    %144 = vector.extract_strided_slice %8 {offsets = [24, 0], sizes = [8, 128], strides = [1, 1]} : vector<32x128xf32> to vector<8x128xf32>
    %145 = arith.truncf %123 : vector<8x32xf32> to vector<8x32xbf16>
    %cst_32 = arith.constant dense<0.000000e+00> : vector<8x128xf32>
    %146 = tpu.matmul %145, %18, %cst_32 {dimension_numbers = #tpu.dot_dimension_numbers<[1], [0], [0], [1], [0, 0, 1, 1], [], []>} : vector<8x32xbf16>, vector<32x128xbf16>, vector<8x128xf32> -> vector<8x128xf32>
    %147 = arith.addf %144, %146 : vector<8x128xf32>
    %148 = math.tanh %147 : vector<8x128xf32>
    %149 = arith.negf %147 : vector<8x128xf32>
    %150 = math.exp %149 : vector<8x128xf32>
    %cst_33 = arith.constant 1.000000e+00 : f32
    %151 = vector.broadcast %cst_33 : f32 to vector<8x128xf32>
    %152 = arith.addf %151, %150 : vector<8x128xf32>
    %153 = arith.divf %151, %152 : vector<8x128xf32>
    %154 = arith.select %14, %148, %153 : vector<8x128xi1>, vector<8x128xf32>
    %155 = vector.extract_strided_slice %154 {offsets = [0, 0], sizes = [8, 32], strides = [1, 1]} : vector<8x128xf32> to vector<8x32xf32>
    %156 = vector.extract_strided_slice %154 {offsets = [0, 32], sizes = [8, 32], strides = [1, 1]} : vector<8x128xf32> to vector<8x32xf32>
    %157 = vector.extract_strided_slice %154 {offsets = [0, 64], sizes = [8, 32], strides = [1, 1]} : vector<8x128xf32> to vector<8x32xf32>
    %158 = vector.extract_strided_slice %154 {offsets = [0, 96], sizes = [8, 32], strides = [1, 1]} : vector<8x128xf32> to vector<8x32xf32>
    %159 = arith.mulf %156, %121 : vector<8x32xf32>
    %160 = arith.mulf %155, %157 : vector<8x32xf32>
    %161 = arith.addf %159, %160 : vector<8x32xf32>
    %162 = math.tanh %161 : vector<8x32xf32>
    %163 = arith.mulf %158, %162 : vector<8x32xf32>
    %164 = tpu.concatenate %163, %143 in 1 : vector<8x32xf32>, vector<8x32xf32> -> vector<8x64xf32>
    %165 = arith.truncf %164 : vector<8x64xf32> to vector<8x64xbf16>
    %cst_34 = arith.constant dense<0.000000e+00> : vector<8x128xf32>
    %166 = tpu.matmul %165, %19, %cst_34 {dimension_numbers = #tpu.dot_dimension_numbers<[1], [0], [0], [1], [0, 0, 1, 1], [], []>} : vector<8x64xbf16>, vector<64x128xbf16>, vector<8x128xf32> -> vector<8x128xf32>
    %167 = arith.addf %166, %17 : vector<8x128xf32>
    %168 = math.tanh %167 : vector<8x128xf32>
    %169 = arith.negf %167 : vector<8x128xf32>
    %170 = math.exp %169 : vector<8x128xf32>
    %cst_35 = arith.constant 1.000000e+00 : f32
    %171 = vector.broadcast %cst_35 : f32 to vector<8x128xf32>
    %172 = arith.addf %171, %170 : vector<8x128xf32>
    %173 = arith.divf %171, %172 : vector<8x128xf32>
    %174 = arith.select %14, %168, %173 : vector<8x128xi1>, vector<8x128xf32>
    %175 = vector.extract_strided_slice %174 {offsets = [0, 0], sizes = [8, 32], strides = [1, 1]} : vector<8x128xf32> to vector<8x32xf32>
    %176 = vector.extract_strided_slice %174 {offsets = [0, 32], sizes = [8, 32], strides = [1, 1]} : vector<8x128xf32> to vector<8x32xf32>
    %177 = vector.extract_strided_slice %174 {offsets = [0, 64], sizes = [8, 32], strides = [1, 1]} : vector<8x128xf32> to vector<8x32xf32>
    %178 = vector.extract_strided_slice %174 {offsets = [0, 96], sizes = [8, 32], strides = [1, 1]} : vector<8x128xf32> to vector<8x32xf32>
    %179 = arith.mulf %176, %141 : vector<8x32xf32>
    %180 = arith.mulf %175, %177 : vector<8x32xf32>
    %181 = arith.addf %179, %180 : vector<8x32xf32>
    %182 = math.tanh %181 : vector<8x32xf32>
    %183 = arith.mulf %178, %182 : vector<8x32xf32>
    %c0_36 = arith.constant 0 : index
    %c0_37 = arith.constant 0 : index
    %184 = vector.load %arg10[%c0_36, %c0_37] : memref<8x32xf32, #tpu.memory_space<vmem>>, vector<8x32xf32>
    tpu.vector_store %arg10[%c0_36, %c0_37], %163 {strides = array<i32>} : memref<8x32xf32, #tpu.memory_space<vmem>>, vector<8x32xf32>,
    %c0_38 = arith.constant 0 : index
    %c0_39 = arith.constant 0 : index
    %185 = vector.load %arg11[%c0_38, %c0_39] : memref<8x32xf32, #tpu.memory_space<vmem>>, vector<8x32xf32>
    tpu.vector_store %arg11[%c0_38, %c0_39], %183 {strides = array<i32>} : memref<8x32xf32, #tpu.memory_space<vmem>>, vector<8x32xf32>,
    %c0_40 = arith.constant 0 : index
    %c0_41 = arith.constant 0 : index
    %186 = vector.load %arg12[%c0_40, %c0_41] : memref<8x32xf32, #tpu.memory_space<vmem>>, vector<8x32xf32>
    tpu.vector_store %arg12[%c0_40, %c0_41], %161 {strides = array<i32>} : memref<8x32xf32, #tpu.memory_space<vmem>>, vector<8x32xf32>,
    %c0_42 = arith.constant 0 : index
    %c0_43 = arith.constant 0 : index
    %187 = vector.load %arg13[%c0_42, %c0_43] : memref<8x32xf32, #tpu.memory_space<vmem>>, vector<8x32xf32>
    tpu.vector_store %arg13[%c0_42, %c0_43], %181 {strides = array<i32>} : memref<8x32xf32, #tpu.memory_space<vmem>>, vector<8x32xf32>,
    %c1_i32 = arith.constant 1 : i32
    %188 = arith.cmpi eq, %arg0, %c1_i32 : i32
    %189 = arith.extui %188 : i1 to i32
    %c0_i32_44 = arith.constant 0 : i32
    %190 = arith.cmpi ne, %189, %c0_i32_44 : i32
    scf.if %190 {
      %191 = arith.truncf %183 : vector<8x32xf32> to vector<8x32xbf16>
      %c0_45 = arith.constant 0 : index
      %c0_46 = arith.constant 0 : index
      %192 = vector.load %arg7[%c0_45, %c0_46] : memref<32x128xbf16, #tpu.memory_space<vmem>>, vector<32x128xbf16>
      %cst_47 = arith.constant dense<0.000000e+00> : vector<8x128xf32>
      %193 = tpu.matmul %191, %192, %cst_47 {dimension_numbers = #tpu.dot_dimension_numbers<[1], [0], [0], [1], [0, 0, 1, 1], [], []>} : vector<8x32xbf16>, vector<32x128xbf16>, vector<8x128xf32> -> vector<8x128xf32>
      %c0_48 = arith.constant 0 : index
      %c0_49 = arith.constant 0 : index
      %194 = vector.load %arg8[%c0_48, %c0_49] : memref<1x128xf32, #tpu.memory_space<vmem>>, vector<1x128xf32>
      %195 = vector.broadcast %194 : vector<1x128xf32> to vector<8x128xf32>
      %196 = arith.addf %193, %195 : vector<8x128xf32>
      %c0_50 = arith.constant 0 : index
      %c0_51 = arith.constant 0 : index
      %197 = vector.load %arg9[%c0_50, %c0_51] : memref<8x128xf32, #tpu.memory_space<vmem>>, vector<8x128xf32>
      tpu.vector_store %arg9[%c0_50, %c0_51], %196 {strides = array<i32>} : memref<8x128xf32, #tpu.memory_space<vmem>>, vector<8x128xf32>,
    } else {
    }
    return
  }
  func.func @transform_0(%arg0: i32) -> (i32, i32) {
    %c0_i32 = arith.constant 0 : i32
    %c0_i32_0 = arith.constant 0 : i32
    return %arg0, %c0_i32 : i32, i32
  }
  func.func @transform_1(%arg0: i32) -> (i32, i32) {
    %c0_i32 = arith.constant 0 : i32
    %c0_i32_0 = arith.constant 0 : i32
    %c0_i32_1 = arith.constant 0 : i32
    return %c0_i32, %c0_i32_0 : i32, i32
  }
  func.func @transform_2(%arg0: i32) -> (i32, i32) {
    %c0_i32 = arith.constant 0 : i32
    %c0_i32_0 = arith.constant 0 : i32
    %c0_i32_1 = arith.constant 0 : i32
    return %c0_i32, %c0_i32_0 : i32, i32
  }
  func.func @transform_3(%arg0: i32) -> (i32, i32) {
    %c0_i32 = arith.constant 0 : i32
    %c0_i32_0 = arith.constant 0 : i32
    %c0_i32_1 = arith.constant 0 : i32
    return %c0_i32, %c0_i32_0 : i32, i32
  }
  func.func @transform_4(%arg0: i32) -> (i32, i32) {
    %c0_i32 = arith.constant 0 : i32
    %c0_i32_0 = arith.constant 0 : i32
    %c0_i32_1 = arith.constant 0 : i32
    return %c0_i32, %c0_i32_0 : i32, i32
  }
  func.func @transform_5(%arg0: i32) -> (i32, i32) {
    %c0_i32 = arith.constant 0 : i32
    %c0_i32_0 = arith.constant 0 : i32
    %c0_i32_1 = arith.constant 0 : i32
    return %c0_i32, %c0_i32_0 : i32, i32
  }
  func.func @transform_6(%arg0: i32) -> (i32, i32) {
    %c0_i32 = arith.constant 0 : i32
    %c0_i32_0 = arith.constant 0 : i32
    %c0_i32_1 = arith.constant 0 : i32
    return %c0_i32, %c0_i32_0 : i32, i32
  }
  func.func @transform_7(%arg0: i32) -> (i32, i32) {
    %c0_i32 = arith.constant 0 : i32
    %c0_i32_0 = arith.constant 0 : i32
    %c0_i32_1 = arith.constant 0 : i32
    return %c0_i32, %c0_i32_0 : i32, i32
  }
  func.func @transform_8(%arg0: i32) -> (i32, i32) {
    %c0_i32 = arith.constant 0 : i32
    %c0_i32_0 = arith.constant 0 : i32
    %c0_i32_1 = arith.constant 0 : i32
    return %c0_i32, %c0_i32_0 : i32, i32
  }
}

</mosaic_0001>

<bundles_post_ra>
// kernel: tpu_custom_call.1
= control target key start
LH: loop header
LB: loop body
LE: loop exit
PB: predicated region body
PF: predicated region fallthrough
CT: control target
= control target key end

     0   :  { %13 = vsyncpa [#allocation7], 0  ;;  %s1963_s0 = inlined_call_operand.vmem [shape: bf16[64,32], index: 0, kind: input, shape index: {}]   ;;  %s1964_s1 = inlined_call_operand.vmem [shape: bf16[32,128], index: 1, kind: input, shape index: {}]   ;;  %s1965_s2 = inlined_call_operand.hbm [shape: bf16[32,128], index: 2, kind: input, shape index: {}]   ;;  %s1966_s3 = inlined_call_operand.vmem [shape: f32[1,128], index: 3, kind: input, shape index: {}]   ;;  %s1967_s4 = inlined_call_operand.vmem [shape: bf16[64,128], index: 4, kind: input, shape index: {}]   ;;  %s1968_s5 = inlined_call_operand.vmem [shape: f32[1,128], index: 5, kind: input, shape index: {}]   ;;  %s1969_s6 = inlined_call_operand.vmem [shape: bf16[32,128], index: 6, kind: input, shape index: {}]   ;;  %s1970_s7 = inlined_call_operand.vmem [shape: f32[1,128], index: 7, kind: input, shape index: {}]   ;;  %s1971_s8 = inlined_call_operand.hbm [shape: f32[8,128], index: 8, kind: output, shape index: {}]  }
   0x1   :  { %14 = vsyncpa [#allocation8], 0  ;;  %s1664_s27 = smov 0  }
   0x2 LB: > { %s1670_s28 = sadd.s32 4294967295, %s1604_s27   ;;  %p1236_p0 = scmp.ge.s32.totalorder %s1604_s27, 1  ;;  %s1604_s27 = sphi %s1664_s27, %s20_s27  }
   0x3   : > { %p219_p1 = scmp.lt.s32.totalorder %s1604_s27, 3  ;;  %s1606_s29 = smov [#allocation6]  }
   0x4   : > { %s234_s30 = sshll.u32 %s1606_s29, 4  ;;  %p1972_p4 = scmp.eq.s32.totalorder %s1670_s28, 0  ;;  %s235_s30 = int_to_ptr.vmem [resolvable:$true] %s234_s30 }
   0x5   : > { %p1675_p3 = pnand %p1236_p0, %p219_p1  ;;  %s1536_s13 = scalar_lea.hbm %s1965_s2, 256 }
   0x6   : > { %p1537_p7 = scmp.ne.s32.totalorder %s1965_s2, %s1536_s13  ;;  %p1543_p11 = scmp.lt.u32.totalorder %s1536_s13, %s1965_s2 }
   0x7   : > { %s1974_s9 = scalar_select %p1675_p3, 1, 0 }
   0x8   : > { %p1426_p5 = pneg %p1675_p3 }
   0xa   : > { %p1684_p6 = pnand %p1972_p4, %p1426_p5 }
   0xc   : > { %p1538_p8 = pneg %p1684_p6 }
   0xe   : > { %p1539_p9 = pnand %p1538_p8, %p1537_p7 }
  0x10   : > { %p1540_p10 = pneg %p1539_p9 }
  0x12   : > { %p1545_p12 = pnand %p1543_p11, %p1540_p10 }
  0x14   : > { %1548 = shalt.err (!%p1545_p12)
}
  0x15   : > { %s1549_s18 = scalar_lea.vmem %s235_s30, 256  ;;  %p1557_p5 = scmp.lt.s32.totalorder %s235_s30, %s235_s30 }
  0x16   : > { %p1550_p13 = scmp.ne.s32.totalorder %s235_s30, %s1549_s18  ;;  %p1558_p2 = scmp.lt.s32.totalorder %s1549_s18, %s1549_s18 }
  0x18   : > { %p1552_p0 = pnand %p1550_p13, %p1538_p8  ;;  %p1559_p4 = por %p1558_p2, %p1557_p5 }
  0x1a   : > { %p1553_p1 = pneg %p1552_p0 }
  0x1c   : > { %p1560_p3 = pnand %p1559_p4, %p1553_p1 }
  0x1e   : > { %1563 = shalt.err (!%p1560_p3)
}
  0x1f   : > { %s1607_s19 = smov 64   ;;  %s1608_s20 = smov 4  }
  0x20   : > { %1429 = dma.hbm_to_vmem [thread:$0]  (!%p1684_p6), %s1965_s2, 256, %s235_s30, [#allocation7], %s1607_s19, %s1607_s19, %s1608_s20  }
  0x21   : > { %p1976_p7 = scmp.ne.s32.totalorder %s1974_s9, 0 }
  0x22   : > { %p1977_p9 = scmp.eq.s32.totalorder (!%p1976_p7), %s1670_s28, 0 }
  0x23   : > { %274 = sbr.rel (%p1976_p7) target bundleno = 3918 (0xf4e), region = 52 }
  0x2a   : > { %1595 = dma.done.wait (%p1977_p9), [#allocation7], 256   ;;  %p1978_p8 = pmov %p1977_p9 }
  0x2b   : > { %s1241_s23 = sshll.u32 %s1670_s28, 2  ;;  %p1979_p3 = scmp.ne.s32.totalorder %s1670_s28, 0 }
  0x2c   : > { %1597 = vsyncadd (%p1978_p8), [#allocation7], 4294967040  ;;  %p304_p2 = scmp.lt.s32.totalorder %s1241_s23, 7  ;;  %vm314_vm0 = vcmask (!%p1979_p3), 261120   ;;  %v1609_v0 = vmov (!%p1979_p3), 0.0  }
  0x2d   : > { %313 = sbr.rel (%p1979_p3) target bundleno = 52 (0x34), region = 60  ;;  %315 = vst.msk [vmem:[#allocation2] sm:$0xff] (!%p1979_p3), %vm314_vm0, %v1609_v0  ;;  %316 = vst.msk [vmem:[#allocation3] sm:$0xff] (!%p1979_p3), %vm314_vm0, %v1609_v0 }
  0x2e   : > { %s1983_s23 = smov (!%p304_p2, %s1241_s23), 7  ;;  %317 = vst.msk [vmem:[#allocation4] sm:$0xff] (!%p1979_p3), %vm314_vm0, %v1609_v0  ;;  %318 = vst.msk [vmem:[#allocation5] sm:$0xff] (!%p1979_p3), %vm314_vm0, %v1609_v0 }
  0x2f   : > { %s1242_s24 = sshll.u32 %s1983_s23, 2 }
  0x30   : > { %s307_s29 = scalar_lea.vmem %s1963_s0, %s1242_s24 }
  0x34 PF: > { %v1460_v1 = vld [vmem:[%s1964_s1] sm:$0xff]   ;;  %v1610_v2 = vmov 0.0   ;;  %v1462_v4 = vld [vmem:[%s1964_s1 + $0x8] sm:$0xff]   ;;  %vm356_vm1 = vcmask 261120   ;;  %vm1611_vm2 = vmmov 0   ;;  %v412_v26 = vlaneseq  ;;  %s1612_s14 = smov 64  }
  0x35   : > { %1330 = vmatprep.subr.bf16.mxu1 %v1610_v2  ;;  %v1720_v3 = vld [vmem:[#allocation6] sm:$0xff]   ;;  %1322 = vmatprep.subr.bf16.mxu0 %v1460_v1  ;;  %v1726_v5 = vld [vmem:[#allocation6 + $0x8] sm:$0xff]   ;;  %v438_v33 = vld [vmem:[#allocation4] sm:$0xff]  ;;  %s1613_s15 = smov 32   ;;  %vm560_vm6 = vcmask 523264   ;;  %s1614_s26 = smov 96  }
  0x36   : > { %1323 = vmatpush3.bf16.msra.mxu0 %v1460_v1  ;;  %1331 = vmatpush3.bf16.msra.mxu1 %v1720_v3  ;;  %v1464_v6 = vld [vmem:[%s307_s29] sm:$0xff]   ;;  %v1465_v7 = vld [vmem:[%s307_s29 + $0x8] sm:$0xff]   ;;  %v413_v28 = vand.u32 127, %v412_v26  ;;  %v1782_v42 = vld [vmem:[%s1967_s4 + $0x10] sm:$0xff]   ;;  %p1274_p4 = scmp.ne.s32.totalorder %s1670_s28, 1 }
  0x37   : > { %1324 = vmatprep.subr.bf16.mxu0 %v1462_v4  ;;  %1332 = vmatprep.subr.bf16.mxu1 %v1610_v2  ;;  %v436_v8 = vld [vmem:[#allocation2] sm:$0xff]  ;;  %v1775_v41 = vld [vmem:[%s1967_s4 + $0x8] sm:$0xff]   ;;  %v1791_v44 = vld [vmem:[%s1967_s4 + $0x18] sm:$0xff]   ;;  %s1616_s9 = smov (!%p1274_p4), 32   ;;  %vm1617_vm7 = vmmov (!%p1274_p4), 0  }
  0x38   : > { %1334 = vmatprep.mubr.msk.bf16.mxu1 %vm1611_vm2, %v1610_v2  ;;  %1326 = vmatprep.mubr.msk.bf16.mxu0 %vm356_vm1, %v1464_v6  ;;  %v440_v9 = vpack.c.bf16 %v436_v8, %v436_v8  ;;  %v1244_v10 = vld [vmem:[%s1966_s3] ss:$0 sm:$0xff]  ;;  %vm414_vm3 = vcmp.ge.s32.totalorder %v413_v28, 64  ;;  %vm415_vm4 = vcmp.lt.s32.totalorder %v413_v28, 96  ;;  %v437_v45 = vld [vmem:[#allocation3] sm:$0xff] }
  0x39   : > { %vm1754_vm5 = vmand %vm414_vm3, %vm415_vm4  ;;  %v1769_v40 = vld [vmem:[%s1967_s4] sm:$0xff]  }
  0x3a   : > { %1325 = vmatpush3.bf16.msra.mxu0 %v1462_v4  ;;  %1333 = vmatpush3.bf16.msra.mxu1 %v1726_v5  ;;  %v1820_v62 = vld [vmem:[%s1968_s5] ss:$0 sm:$0xff] }
  0x3b   : > { %1338 = vmatprep.subr.bf16.mxu0 %v1610_v2  ;;  %1350 = vmatprep.subr.bf16.mxu1 %v1610_v2 }
  0x3d   : > { %1327 = vmatmul.mubr.msk.bf16.vlgmr.msra.gmra.mrb[0].mxu0 %vm356_vm1, %v1465_v7  ;;  %1335 = vmatmul.mubr.msk.bf16.vlgmr.msra.gmra.mrb[0].mxu1 %vm356_vm1, %v440_v9 }
  0x3e   : > { %1351 = vmatpush3.bf16.msra.mxu1 %v1720_v3  ;;  %1354 = vmatprep.mubr.msk.bf16.mxu1 %vm1611_vm2, %v1610_v2 }
  0x3f   : > { %1352 = vmatprep.subr.bf16.mxu1 %v1610_v2  ;;  %1346 = vmatprep.mubr.msk.bf16.mxu0 %vm1611_vm2, %v1610_v2 }
  0x40   : > { %1339 = vmatpush3.bf16.msra.mxu0 %v1769_v40 }
  0x41   : > { %1340 = vmatprep.subr.bf16.mxu0 %v1610_v2 }
  0x42   : > { %1353 = vmatpush3.bf16.msra.mxu1 %v1726_v5 }
  0x43   : > { %1358 = vmatprep.subr.bf16.mxu1 %v1610_v2 }
  0x44   : > { %1341 = vmatpush3.bf16.msra.mxu0 %v1775_v41 }
  0x45   : > { %1342 = vmatprep.subr.bf16.mxu0 %v1610_v2 }
  0x48   : > { %1343 = vmatpush3.bf16.msra.mxu0 %v1782_v42 }
  0x49   : > { %1344 = vmatprep.subr.bf16.mxu0 %v1610_v2 }
  0x4c   : > { %1345 = vmatpush3.bf16.msra.mxu0 %v1791_v44 }
  0x4d   : > { %1370 = vmatprep.subr.bf16.mxu0 %v1610_v2 }
 0x110   : > { %v1328_v11 = vpop.f32.mrb[0].mxu0  ;;  %v490_v12 = vpop.f32.mrb[0].mxu1 }
 0x111   : > { %v1748_v13 = vadd.f32 %v1328_v11, %v1244_v10  ;;  %v397_v14 = vpop.f32.mrb[1].mxu0  ;;  %v1336_v15 = vpop.f32.mrb[1].mxu1 }
 0x112   : > { %v398_v16 = vadd.f32 %v1244_v10, %v397_v14  ;;  %v1329_v17 = vpop.f32.mrb[2].mxu0  ;;  %v493_v18 = vpop.f32.mrb[2].mxu1 }
 0x113   : > { %v1750_v19 = vadd.f32 %v1329_v17, %v1244_v10  ;;  %v400_v20 = vpop.f32.mrb[3].mxu0  ;;  %v1337_v21 = vpop.f32.mrb[3].mxu1 }
 0x114   : > { %v496_v22 = vadd.f32 %v490_v12, %v398_v16  ;;  %v1752_v23 = vadd.f32 %v1244_v10, %v400_v20  ;;  %v439_v20 = vld [vmem:[#allocation5] sm:$0xff] }
 0x116   : > { %v1255_v24 = vmul.f32 -1.442695, %v496_v22 }
 0x118   : > { %1470 = vpow2.f32 %v1255_v24 }
 0x119   : > { %1472 = vtanh.f32 %v496_v22 }
 0x122   : > { %v1471_v25 = vpop.eup %1470 }
 0x123   : > { %v501_v27 = vadd.f32 1.0, %v1471_v25  ;;  %v1473_v30 = vpop.eup %1472 }
 0x125   : > { %1474 = vrcp.f32 %v501_v27 }
 0x12f   : > { %v1475_v31 = vpop.eup %1474 }
 0x130   : > { %v504_v32 = vsel %vm1754_vm5, %v1473_v30, %v1475_v31 }
 0x131   : > { %511 = vrot.lane.b32.xlu0 %v504_v32, %s1612_s14 }
 0x135   : > { %506 = vrot.lane.b32.xlu0 %v438_v33, %s1613_s15 }
 0x1a3   : > { %v512_v34 = vpop.permute.xlu0 %511 }
 0x1a4   : > { %v514_v35 = vmul.f32 %v512_v34, %v504_v32 }
 0x1a6   : > { %516 = vrot.lane.b32.xlu1 %v514_v35, %s1613_s15 }
 0x1a7   : > { %v507_v36 = vpop.permute.xlu0 %506 }
 0x1a8   : > { %v509_v37 = vmul.f32 %v507_v36, %v504_v32 }
 0x218   : > { %v517_v38 = vpop.permute.xlu1 %516 }
 0x219   : > { %v1763_v39 = vadd.f32 %v517_v38, %v509_v37 }
 0x21b   : > { %1476 = vtanh.f32 %v1763_v39 }
 0x225   : > { %v1477_v43 = vpop.eup %1476 }
 0x226   : > { %522 = vrot.lane.b32.xlu1 %v1477_v43, %s1612_s14 }
 0x298   : > { %v523_v46 = vpop.permute.xlu1 %522 }
 0x299   : > { %v525_v47 = vmul.f32 %v523_v46, %v504_v32 }
 0x29b   : > { %v1455_v48 = vpack.i.bf16 %v437_v45, %v525_v47  ;;  %v633_v49 = vpack.c.bf16 %v525_v47, %v525_v47 }
 0x29d   : > { %1456 = vrot.lane.b32.xlu0 %v1455_v48, %s1613_s15  ;;  %635 = vrot.lane.b32.xlu1 %v633_v49, %s1613_s15 }
 0x30f   : > { %v1457_v50 = vpop.permute.xlu0 %1456  ;;  %v636_v51 = vpop.permute.xlu1 %635 }
 0x310   : > { %v1459_v52 = vunpack.i.h.bf16 %v1457_v50  ;;  %v1458_v53 = vunpack.i.l.bf16 %v1457_v50  ;;  %1355 = vmatmul.mubr.msk.bf16.vlgmr.msra.gmra.mrb[4].mxu1 %vm356_vm1, %v636_v51 }
 0x311   : > { %1359 = vmatpush3.bf16.msra.mxu1 %v1769_v40  ;;  %1366 = vmatprep.mubr.msk.bf16.mxu1 %vm1611_vm2, %v1610_v2 }
 0x312   : > { %v534_v54 = vsel %vm356_vm1, %v1458_v53, %v1459_v52  ;;  %1360 = vmatprep.subr.bf16.mxu1 %v1610_v2 }
 0x313   : > { %v535_v55 = vpack.c.bf16 %v534_v54, %v534_v54 }
 0x315   : > { %1347 = vmatmul.mubr.msk.bf16.vlgmr.msra.gmra.mrb[4].mxu0 %vm560_vm6, %v535_v55  ;;  %1361 = vmatpush3.bf16.msra.mxu1 %v1775_v41 }
 0x316   : > { %1371 = vmatpush3.bf16.msra.mxu0 %v1720_v3  ;;  %1362 = vmatprep.subr.bf16.mxu1 %v1610_v2 }
 0x317   : > { %1372 = vmatprep.subr.bf16.mxu0 %v1610_v2  ;;  %1374 = vmatprep.mubr.msk.bf16.mxu0 %vm1611_vm2, %v1610_v2 }
 0x319   : > { %1363 = vmatpush3.bf16.msra.mxu1 %v1782_v42 }
 0x31a   : > { %1373 = vmatpush3.bf16.msra.mxu0 %v1726_v5  ;;  %1364 = vmatprep.subr.bf16.mxu1 %v1610_v2 }
 0x31b   : > { %1378 = vmatprep.subr.bf16.mxu0 %v1610_v2 }
 0x31d   : > { %1365 = vmatpush3.bf16.msra.mxu1 %v1791_v44 }
 0x31e   : > { %1390 = vmatprep.subr.bf16.mxu1 %v1610_v2 }
 0x3e3   : > { %v674_v56 = vpop.f32.mrb[4].mxu1 }
 0x3e4   : > { %v680_v57 = vadd.f32 %v674_v56, %v1752_v23  ;;  %v1356_v58 = vpop.f32.mrb[5].mxu1 }
 0x3e5   : > { %v677_v59 = vpop.f32.mrb[6].mxu1 }
 0x3e6   : > { %v1263_v60 = vmul.f32 -1.442695, %v680_v57  ;;  %v1357_v61 = vpop.f32.mrb[7].mxu1 }
 0x3e8   : > { %1478 = vpow2.f32 %v1263_v60  ;;  %v598_v63 = vpop.f32.mrb[4].mxu0 }
 0x3e9   : > { %v599_v0 = vadd.f32 %v1820_v62, %v598_v63  ;;  %v1348_v1 = vpop.f32.mrb[5].mxu0 }
 0x3ea   : > { %v601_v4 = vpop.f32.mrb[6].mxu0 }
 0x3eb   : > { %v1261_v6 = vmul.f32 -1.442695, %v599_v0  ;;  %v1349_v7 = vpop.f32.mrb[7].mxu0 }
 0x3ed   : > { %1480 = vpow2.f32 %v1261_v6 }
 0x3ee   : > { %1482 = vtanh.f32 %v680_v57 }
 0x3f2   : > { %v1479_v8 = vpop.eup %1478 }
 0x3f3   : > { %v685_v9 = vadd.f32 1.0, %v1479_v8 }
 0x3f5   : > { %1484 = vrcp.f32 %v685_v9 }
 0x3f6   : > { %1486 = vtanh.f32 %v599_v0 }
 0x3f7   : > { %v1481_v10 = vpop.eup %1480 }
 0x3f8   : > { %v608_v11 = vadd.f32 1.0, %v1481_v10  ;;  %v1483_v12 = vpop.eup %1482 }
 0x3fa   : > { %1488 = vrcp.f32 %v608_v11 }
 0x3ff   : > { %v1485_v14 = vpop.eup %1484 }
 0x400   : > { %v688_v15 = vsel %vm1754_vm5, %v1483_v12, %v1485_v14  ;;  %v1487_v16 = vpop.eup %1486 }
 0x401   : > { %691 = vrot.lane.b32.xlu1 %v688_v15, %s1612_s14  ;;  %v689_v26 = vmul.f32 %v688_v15, %v1763_v39 }
 0x404   : > { %v1489_v17 = vpop.eup %1488 }
 0x405   : > { %v611_v18 = vsel %vm1754_vm5, %v1487_v16, %v1489_v17 }
 0x406   : > { %618 = vrot.lane.b32.xlu0 %v611_v18, %s1612_s14 }
 0x40a   : > { %613 = vrot.lane.b32.xlu0 %v439_v20, %s1613_s15 }
 0x473   : > { %v692_v21 = vpop.permute.xlu1 %691 }
 0x474   : > { %v694_v22 = vmul.f32 %v692_v21, %v688_v15 }
 0x476   : > { %696 = vrot.lane.b32.xlu0 %v694_v22, %s1613_s15 }
 0x478   : > { %v619_v23 = vpop.permute.xlu0 %618 }
 0x479   : > { %v621_v24 = vmul.f32 %v619_v23, %v611_v18 }
 0x47b   : > { %623 = vrot.lane.b32.xlu1 %v621_v24, %s1613_s15 }
 0x47c   : > { %v614_v25 = vpop.permute.xlu0 %613 }
 0x47d   : > { %v616_v30 = vmul.f32 %v614_v25, %v611_v18 }
 0x4e8   : > { %v697_v27 = vpop.permute.xlu0 %696 }
 0x4e9   : > { %v1833_v28 = vadd.f32 %v697_v27, %v689_v26 }
 0x4eb   : > { %1490 = vtanh.f32 %v1833_v28 }
 0x4ed   : > { %v624_v31 = vpop.permute.xlu1 %623 }
 0x4ee   : > { %v1836_v32 = vadd.f32 %v624_v31, %v616_v30 }
 0x4f0   : > { %1492 = vtanh.f32 %v1836_v32 }
 0x4f5   : > { %v1491_v33 = vpop.eup %1490 }
 0x4f6   : > { %702 = vrot.lane.b32.xlu0 %v1491_v33, %s1612_s14 }
 0x4fa   : > { %v1493_v34 = vpop.eup %1492 }
 0x4fb   : > { %629 = vrot.lane.b32.xlu1 %v1493_v34, %s1612_s14 }
 0x568   : > { %v703_v35 = vpop.permute.xlu0 %702 }
 0x569   : > { %v705_v36 = vmul.f32 %v703_v35, %v688_v15 }
 0x56b   : > { %707 = vrot.lane.b32.xlu1 %v705_v36, %s1613_s15  ;;  %v784_v37 = vpack.c.bf16 %v705_v36, %v705_v36 }
 0x56d   : > { %v630_v38 = vpop.permute.xlu1 %629 }
 0x56e   : > { %v632_v39 = vmul.f32 %v630_v38, %v611_v18 }
 0x56f   : > { %786 = vrot.lane.b32.xlu1 %v784_v37, %s1613_s15 }
 0x570   : > { %711 = vrot.lane.b32.xlu0 %v632_v39, %s1612_s14 }
 0x5dd   : > { %v708_v43 = vpop.permute.xlu1 %707 }
 0x5e1   : > { %v787_v45 = vpop.permute.xlu1 %786 }
 0x5e2   : > { %1375 = vmatmul.mubr.msk.bf16.vlgmr.msra.gmra.mrb[8].mxu0 %vm356_vm1, %v787_v45  ;;  %v712_v46 = vpop.permute.xlu0 %711 }
 0x5e3   : > { %v714_v47 = vsel %vm356_vm1, %v708_v43, %v712_v46  ;;  %1379 = vmatpush3.bf16.msra.mxu0 %v1769_v40  ;;  %1386 = vmatprep.mubr.msk.bf16.mxu0 %vm1611_vm2, %v1610_v2 }
 0x5e4   : > { %v715_v48 = vpack.c.bf16 %v714_v47, %v714_v47  ;;  %1380 = vmatprep.subr.bf16.mxu0 %v1610_v2 }
 0x5e6   : > { %1367 = vmatmul.mubr.msk.bf16.vlgmr.msra.gmra.mrb[8].mxu1 %vm560_vm6, %v715_v48 }
 0x5e7   : > { %1381 = vmatpush3.bf16.msra.mxu0 %v1775_v41  ;;  %1391 = vmatpush3.bf16.msra.mxu1 %v1720_v3 }
 0x5e8   : > { %1382 = vmatprep.subr.bf16.mxu0 %v1610_v2  ;;  %1392 = vmatprep.subr.bf16.mxu1 %v1610_v2 }
 0x5e9   : > { %1394 = vmatprep.mubr.msk.bf16.mxu1 %vm1611_vm2, %v1610_v2 }
 0x5eb   : > { %1383 = vmatpush3.bf16.msra.mxu0 %v1782_v42  ;;  %1393 = vmatpush3.bf16.msra.mxu1 %v1726_v5 }
 0x5ec   : > { %1384 = vmatprep.subr.bf16.mxu0 %v1610_v2  ;;  %1398 = vmatprep.subr.bf16.mxu1 %v1610_v2 }
 0x5ef   : > { %1385 = vmatpush3.bf16.msra.mxu0 %v1791_v44 }
 0x6b5   : > { %v825_v49 = vpop.f32.mrb[8].mxu0 }
 0x6b6   : > { %v831_v3 = vadd.f32 %v825_v49, %v1748_v13  ;;  %v1376_v50 = vpop.f32.mrb[9].mxu0 }
 0x6b7   : > { %v828_v51 = vpop.f32.mrb[10].mxu0 }
 0x6b8   : > { %v1267_v52 = vmul.f32 -1.442695, %v831_v3  ;;  %v1377_v53 = vpop.f32.mrb[11].mxu0 }
 0x6b9   : > { %v753_v54 = vpop.f32.mrb[8].mxu1 }
 0x6ba   : > { %1494 = vpow2.f32 %v1267_v52  ;;  %v754_v55 = vadd.f32 %v1820_v62, %v753_v54  ;;  %v1368_v56 = vpop.f32.mrb[9].mxu1 }
 0x6bb   : > { %v756_v57 = vpop.f32.mrb[10].mxu1 }
 0x6bc   : > { %v1265_v5 = vmul.f32 -1.442695, %v754_v55  ;;  %v1369_v58 = vpop.f32.mrb[11].mxu1 }
 0x6be   : > { %1496 = vpow2.f32 %v1265_v5 }
 0x6bf   : > { %1498 = vtanh.f32 %v831_v3 }
 0x6c4   : > { %v1495_v59 = vpop.eup %1494 }
 0x6c5   : > { %v836_v60 = vadd.f32 1.0, %v1495_v59 }
 0x6c7   : > { %1500 = vrcp.f32 %v836_v60 }
 0x6c8   : > { %v1497_v61 = vpop.eup %1496  ;;  %1502 = vtanh.f32 %v754_v55 }
 0x6c9   : > { %v763_v63 = vadd.f32 1.0, %v1497_v61  ;;  %v1499_v13 = vpop.eup %1498 }
 0x6cb   : > { %1504 = vrcp.f32 %v763_v63 }
 0x6d1   : > { %v1501_v0 = vpop.eup %1500 }
 0x6d2   : > { %v839_v1 = vsel %vm1754_vm5, %v1499_v13, %v1501_v0  ;;  %v1503_v4 = vpop.eup %1502 }
 0x6d3   : > { %842 = vrot.lane.b32.xlu1 %v839_v1, %s1612_s14  ;;  %v840_v12 = vmul.f32 %v839_v1, %v1833_v28 }
 0x6d5   : > { %v1505_v6 = vpop.eup %1504 }
 0x6d6   : > { %v766_v7 = vsel %vm1754_vm5, %v1503_v4, %v1505_v6 }
 0x6d7   : > { %769 = vrot.lane.b32.xlu0 %v766_v7, %s1612_s14  ;;  %v767_v16 = vmul.f32 %v766_v7, %v1836_v32 }
 0x745   : > { %v843_v8 = vpop.permute.xlu1 %842 }
 0x746   : > { %v845_v9 = vmul.f32 %v843_v8, %v839_v1 }
 0x748   : > { %847 = vrot.lane.b32.xlu1 %v845_v9, %s1613_s15 }
 0x749   : > { %v770_v10 = vpop.permute.xlu0 %769 }
 0x74a   : > { %v772_v11 = vmul.f32 %v770_v10, %v766_v7 }
 0x74c   : > { %774 = vrot.lane.b32.xlu0 %v772_v11, %s1613_s15 }
 0x7ba   : > { %v848_v14 = vpop.permute.xlu1 %847 }
 0x7bb   : > { %v1873_v15 = vadd.f32 %v848_v14, %v840_v12 }
 0x7bd   : > { %1506 = vtanh.f32 %v1873_v15 }
 0x7be   : > { %v775_v17 = vpop.permute.xlu0 %774 }
 0x7bf   : > { %v1877_v18 = vadd.f32 %v775_v17, %v767_v16 }
 0x7c1   : > { %1508 = vtanh.f32 %v1877_v18 }
 0x7c7   : > { %v1507_v20 = vpop.eup %1506 }
 0x7c8   : > { %853 = vrot.lane.b32.xlu1 %v1507_v20, %s1612_s14 }
 0x7cb   : > { %v1509_v21 = vpop.eup %1508 }
 0x7cc   : > { %780 = vrot.lane.b32.xlu0 %v1509_v21, %s1612_s14 }
 0x83a   : > { %v854_v22 = vpop.permute.xlu1 %853 }
 0x83b   : > { %v856_v23 = vmul.f32 %v854_v22, %v839_v1 }
 0x83d   : > { %858 = vrot.lane.b32.xlu0 %v856_v23, %s1613_s15  ;;  %v935_v25 = vpack.c.bf16 %v856_v23, %v856_v23 }
 0x83e   : > { %v781_v24 = vpop.permute.xlu0 %780 }
 0x83f   : > { %v783_v26 = vmul.f32 %v781_v24, %v766_v7 }
 0x841   : > { %937 = vrot.lane.b32.xlu0 %v935_v25, %s1613_s15  ;;  %862 = vrot.lane.b32.xlu1 %v783_v26, %s1612_s14 }
 0x8af   : > { %v859_v27 = vpop.permute.xlu0 %858 }
 0x8b3   : > { %v863_v28 = vpop.permute.xlu1 %862  ;;  %v938_v30 = vpop.permute.xlu0 %937 }
 0x8b4   : > { %v865_v31 = vsel %vm356_vm1, %v859_v27, %v863_v28  ;;  %1395 = vmatmul.mubr.msk.bf16.vlgmr.msra.gmra.mrb[12].mxu1 %vm356_vm1, %v938_v30 }
 0x8b5   : > { %v866_v32 = vpack.c.bf16 %v865_v31, %v865_v31  ;;  %1399 = vmatpush3.bf16.msra.mxu1 %v1769_v40  ;;  %1406 = vmatprep.mubr.msk.bf16.mxu1 %vm1611_vm2, %v1610_v2 }
 0x8b6   : > { %1400 = vmatprep.subr.bf16.mxu1 %v1610_v2 }
 0x8b7   : > { %1387 = vmatmul.mubr.msk.bf16.vlgmr.msra.gmra.mrb[12].mxu0 %vm560_vm6, %v866_v32 }
 0x8b9   : > { %1401 = vmatpush3.bf16.msra.mxu1 %v1775_v41 }
 0x8ba   : > { %1402 = vmatprep.subr.bf16.mxu1 %v1610_v2 }
 0x8bd   : > { %1403 = vmatpush3.bf16.msra.mxu1 %v1782_v42 }
 0x8be   : > { %1404 = vmatprep.subr.bf16.mxu1 %v1610_v2 }
 0x8c1   : > { %1405 = vmatpush3.bf16.msra.mxu1 %v1791_v44 }
 0x987   : > { %v976_v33 = vpop.f32.mrb[12].mxu1 }
 0x988   : > { %v982_v40 = vadd.f32 %v976_v33, %v1750_v19  ;;  %v1396_v34 = vpop.f32.mrb[13].mxu1 }
 0x989   : > { %v979_v35 = vpop.f32.mrb[14].mxu1  ;;  %v1534_v34 = vld [vmem:[%s1969_s6] sm:$0xff] (!%p1274_p4)  }
 0x98a   : > { %v1271_v36 = vmul.f32 -1.442695, %v982_v40  ;;  %v904_v37 = vpop.f32.mrb[12].mxu0  ;;  %v1397_v38 = vpop.f32.mrb[15].mxu1  ;;  %v1535_v35 = vld [vmem:[%s1969_s6 + $0x8] sm:$0xff] (!%p1274_p4)  }
 0x98b   : > { %v905_v39 = vadd.f32 %v1820_v62, %v904_v37  ;;  %v1388_v43 = vpop.f32.mrb[13].mxu0  ;;  %v1275_v37 = vld [vmem:[%s1970_s7] ss:$0 sm:$0xff] (!%p1274_p4) }
 0x98c   : > { %1510 = vpow2.f32 %v1271_v36  ;;  %v907_v41 = vpop.f32.mrb[14].mxu0 }
 0x98d   : > { %v1269_v45 = vmul.f32 -1.442695, %v905_v39  ;;  %v1389_v46 = vpop.f32.mrb[15].mxu0 }
 0x98f   : > { %1512 = vpow2.f32 %v1269_v45 }
 0x990   : > { %1514 = vtanh.f32 %v982_v40  ;;  %v1615_v40 = vmov (!%p1274_p4), 0.0  }
 0x991   : > { %1410 = vmatprep.subr.bf16.mxu0 (!%p1274_p4), %v1615_v40  ;;  %1414 = vmatprep.mubr.msk.bf16.mxu0 (!%p1274_p4), %vm1617_vm7, %v1615_v40 }
 0x992   : > { %1411 = vmatpush3.bf16.msra.mxu0 (!%p1274_p4), %v1534_v34 }
 0x993   : > { %1412 = vmatprep.subr.bf16.mxu0 (!%p1274_p4), %v1615_v40 }
 0x996   : > { %v1511_v42 = vpop.eup %1510  ;;  %1413 = vmatpush3.bf16.msra.mxu0 (!%p1274_p4), %v1535_v35 }
 0x997   : > { %v987_v2 = vadd.f32 1.0, %v1511_v42 }
 0x999   : > { %v1513_v44 = vpop.eup %1512  ;;  %1516 = vrcp.f32 %v987_v2 }
 0x99a   : > { %v914_v47 = vadd.f32 1.0, %v1513_v44  ;;  %1518 = vtanh.f32 %v905_v39  ;;  %v1515_v19 = vpop.eup %1514 }
 0x99c   : > { %1520 = vrcp.f32 %v914_v47 }
 0x9a3   : > { %v1517_v48 = vpop.eup %1516 }
 0x9a4   : > { %v990_v49 = vsel %vm1754_vm5, %v1515_v19, %v1517_v48  ;;  %v1519_v3 = vpop.eup %1518 }
 0x9a5   : > { %993 = vrot.lane.b32.xlu0 %v990_v49, %s1612_s14  ;;  %v991_v56 = vmul.f32 %v990_v49, %v1873_v15 }
 0x9a6   : > { %v1521_v50 = vpop.eup %1520 }
 0x9a7   : > { %v917_v51 = vsel %vm1754_vm5, %v1519_v3, %v1521_v50 }
 0x9a8   : > { %920 = vrot.lane.b32.xlu1 %v917_v51, %s1612_s14  ;;  %v918_v58 = vmul.f32 %v917_v51, %v1877_v18 }
 0xa17   : > { %v994_v52 = vpop.permute.xlu0 %993 }
 0xa18   : > { %v996_v53 = vmul.f32 %v994_v52, %v990_v49 }
 0xa1a   : > { %v921_v54 = vpop.permute.xlu1 %920  ;;  %998 = vrot.lane.b32.xlu0 %v996_v53, %s1613_s15 }
 0xa1b   : > { %v923_v55 = vmul.f32 %v921_v54, %v917_v51 }
 0xa1d   : > { %925 = vrot.lane.b32.xlu1 %v923_v55, %s1613_s15 }
 0xa8c   : > { %v999_v57 = vpop.permute.xlu0 %998 }
 0xa8d   : > { %v1001_v5 = vadd.f32 %v999_v57, %v991_v56 }
 0xa8f   : > { %1522 = vtanh.f32 %v1001_v5  ;;  %v926_v59 = vpop.permute.xlu1 %925 }
 0xa90   : > { %v928_v60 = vadd.f32 %v926_v59, %v918_v58 }
 0xa92   : > { %1524 = vtanh.f32 %v928_v60 }
 0xa99   : > { %v1523_v61 = vpop.eup %1522 }
 0xa9a   : > { %1004 = vrot.lane.b32.xlu0 %v1523_v61, %s1612_s14 }
 0xa9c   : > { %v1525_v63 = vpop.eup %1524 }
 0xa9d   : > { %931 = vrot.lane.b32.xlu1 %v1525_v63, %s1612_s14 }
 0xb0c   : > { %v1005_v13 = vpop.permute.xlu0 %1004 }
 0xb0d   : > { %v1007_v0 = vmul.f32 %v1005_v13, %v990_v49 }
 0xb0f   : > { %v932_v1 = vpop.permute.xlu1 %931  ;;  %1009 = vrot.lane.b32.xlu1 %v1007_v0, %s1613_s15 }
 0xb10   : > { %v934_v4 = vmul.f32 %v932_v1, %v917_v51 }
 0xb12   : > { %1013 = vrot.lane.b32.xlu0 %v934_v4, %s1612_s14 }
 0xb81   : > { %v1010_v6 = vpop.permute.xlu1 %1009 }
 0xb82   : > { %1086 = vst.msk [vmem:[#allocation2] sm:$0xff] %vm356_vm1, %v1010_v6 }
 0xb84   : > { %v1014_v7 = vpop.permute.xlu0 %1013 }
 0xb85   : > { %v1016_v8 = vsel %vm356_vm1, %v1010_v6, %v1014_v7 }
 0xb86   : > { %v1017_v9 = vpack.c.bf16 %v1016_v8, %v1016_v8 }
 0xb88   : > { %1407 = vmatmul.mubr.msk.bf16.vlgmr.msra.gmra.mrb[16].mxu1 %vm560_vm6, %v1017_v9 }
 0xc5b   : > { %v1055_v10 = vpop.f32.mrb[16].mxu1 }
 0xc5c   : > { %v1056_v11 = vadd.f32 %v1820_v62, %v1055_v10  ;;  %v1408_v12 = vpop.f32.mrb[17].mxu1 }
 0xc5d   : > { %v1058_v14 = vpop.f32.mrb[18].mxu1 }
 0xc5e   : > { %v1273_v15 = vmul.f32 -1.442695, %v1056_v11  ;;  %v1409_v16 = vpop.f32.mrb[19].mxu1 }
 0xc60   : > { %1526 = vpow2.f32 %v1273_v15 }
 0xc61   : > { %1528 = vtanh.f32 %v1056_v11 }
 0xc6a   : > { %v1527_v17 = vpop.eup %1526 }
 0xc6b   : > { %v1065_v18 = vadd.f32 1.0, %v1527_v17  ;;  %v1529_v20 = vpop.eup %1528 }
 0xc6d   : > { %1530 = vrcp.f32 %v1065_v18 }
 0xc77   : > { %v1531_v21 = vpop.eup %1530 }
 0xc78   : > { %v1068_v22 = vsel %vm1754_vm5, %v1529_v20, %v1531_v21 }
 0xc79   : > { %1071 = vrot.lane.b32.xlu1 %v1068_v22, %s1612_s14  ;;  %v1069_v62 = vmul.f32 %v1068_v22, %v928_v60 }
 0xceb   : > { %v1072_v23 = vpop.permute.xlu1 %1071 }
 0xcec   : > { %v1074_v24 = vmul.f32 %v1072_v23, %v1068_v22 }
 0xcee   : > { %1076 = vrot.lane.b32.xlu0 %v1074_v24, %s1613_s15 }
 0xd60   : > { %v1077_v25 = vpop.permute.xlu0 %1076 }
 0xd61   : > { %v1079_v26 = vadd.f32 %v1077_v25, %v1069_v62 }
 0xd63   : > { %1532 = vtanh.f32 %v1079_v26 }
 0xd6d   : > { %v1533_v27 = vpop.eup %1532 }
 0xd6e   : > { %1082 = vrot.lane.b32.xlu1 %v1533_v27, %s1612_s14 }
 0xd72   : > { %1093 = vrot.lane.b32.xlu1 %v1001_v5, %s1614_s26 }
 0xde0   : > { %v1083_v28 = vpop.permute.xlu1 %1082 }
 0xde1   : > { %v1085_v30 = vmul.f32 %v1083_v28, %v1068_v22 }
 0xde3   : > { %1088 = vrot.lane.b32.xlu0 %v1085_v30, %s1613_s15  ;;  %v1106_v33 = vpack.c.bf16 (!%p1274_p4), %v1085_v30, %v1085_v30 }
 0xde4   : > { %v1094_v29 = vpop.permute.xlu1 %1093 }
 0xde5   : > { %1096 = vst.msk [vmem:[#allocation4] sm:$0xff] %vm356_vm1, %v1094_v29 }
 0xde7   : > { %1098 = vrot.lane.b32.xlu0 %v1079_v26, %s1614_s26 }
 0xdeb   : > { %1119 = vrot.lane.b32.xlu0 (!%p1274_p4), %v1106_v33, %s1616_s9 }
 0xe54   : > { %1105 = sbr.rel (%p1274_p4) target bundleno = 3893 (0xf35), region = 64 }
 0xe55   : > { %v1089_v31 = vpop.permute.xlu0 %1088 }
 0xe56   : > { %1091 = vst.msk [vmem:[#allocation3] sm:$0xff] %vm356_vm1, %v1089_v31 }
 0xe59   : > { %v1099_v32 = vpop.permute.xlu0 %1098 }
 0xe5a   : > { %1101 = vst.msk [vmem:[#allocation5] sm:$0xff] %vm356_vm1, %v1099_v32 }
 0xe5d   : > { %v1120_v36 = vpop.permute.xlu0 %1119 }
 0xe5e   : > { %1415 = vmatmul.mubr.msk.bf16.vlgmr.msra.gmra.mrb[0].mxu0 %vm356_vm1, %v1120_v36 }
 0xf31   : > { %v1170_v38 = vpop.f32.mrb[0].mxu0 }
 0xf32   : > { %v1171_v39 = vadd.f32 %v1275_v37, %v1170_v38  ;;  %v1416_v43 = vpop.f32.mrb[1].mxu0 }
 0xf33   : > { %v1173_v41 = vpop.f32.mrb[2].mxu0 }
 0xf34   : > { %1176 = vst [vmem:[#allocation9] sm:$0xff] %v1171_v39  ;;  %v1417_v45 = vpop.f32.mrb[3].mxu0 }
 0xf35 PF: > { %p1432_p6 = scmp.eq.s32.totalorder %s1670_s28, 1  ;;  %s1618_s14 = smov [#allocation9]  }
 0xf36   : > { %s1184_s15 = sshll.u32 %s1618_s14, 4  ;;  %s1185_s15 = int_to_ptr.vmem [resolvable:$true] %s1184_s15 }
 0xf37   : > { %s1564_s16 = scalar_lea.vmem %s1185_s15, 128  ;;  %p1571_p13 = scmp.lt.s32.totalorder %s1185_s15, %s1185_s15 }
 0xf38   : > { %p1565_p10 = scmp.ne.s32.totalorder %s1185_s15, %s1564_s16  ;;  %p1572_p0 = scmp.lt.s32.totalorder %s1564_s16, %s1564_s16 }
 0xf3a   : > { %p1566_p11 = pnand %p1565_p10, %p1432_p6  ;;  %p1573_p1 = por %p1572_p0, %p1571_p13 }
 0xf3c   : > { %p1567_p12 = pneg %p1566_p11 }
 0xf3e   : > { %p1574_p5 = pnand %p1573_p1, %p1567_p12 }
 0xf40   : > { %1577 = shalt.err (!%p1574_p5)
}
 0xf41   : > { %s1578_s19 = scalar_lea.hbm %s1971_s8, 128 }
 0xf42   : > { %p1579_p7 = scmp.ne.s32.totalorder %s1971_s8, %s1578_s19  ;;  %p1584_p2 = scmp.lt.u32.totalorder %s1578_s19, %s1971_s8 }
 0xf44   : > { %p1580_p9 = pnand %p1579_p7, %p1432_p6 }
 0xf46   : > { %p1581_p8 = pneg %p1580_p9 }
 0xf48   : > { %p1586_p3 = pnand %p1584_p2, %p1581_p8 }
 0xf4a   : > { %1589 = shalt.err (!%p1586_p3)
}
 0xf4b   : > { %1423 = dma.vmem_to_hbm [thread:$0]  (%p1432_p6), %s1185_s15, 128, %s1971_s8, [#allocation8]  }
 0xf4c   : > { %1599 = dma.done.wait (%p1432_p6), [#allocation8], 128  }
 0xf4d   : > { %1601 = vsyncadd (%p1432_p6), [#allocation8], 4294967168 }
 0xf4e PF: > { %s20_s27 = sadd.s32 1, %s1604_s27  }
 0xf4f   : > { %p17_p4 = scmp.ge.s32.totalorder %s20_s27, 4  }
 0xf51   :  { %19 = sbr.rel (!%p17_p4) target bundleno = 2 (0x2), region = 92 }
 0xf58   :  { %1197 = vsyncpa [#allocation7], 1 }
 0xf59   :  { %1199 = vsyncpa [#allocation7 + $0x1], 1 }
 0xf5a   :  { %1200 = vsyncpa [#allocation8], 1 }
 0xf5b   :  { %1202 = vsyncpa [#allocation8 + $0x1], 1 }

</bundles_post_ra>
